<compile_context>
chip_gen: v6e
topology: v6e:2x2x1
jax: 0.10.0
libtpu: 0.0.40
codegen_flags: <defaults>
</compile_context>

<pallas_src>
from dataclasses import dataclass
from typing import Optional

import jax
import jax.numpy as jnp
from jax.experimental import pallas as pl
from jax.experimental.pallas import tpu as pltpu


@dataclass
class EncoderOutput:
    """Base class for encoder outputs (JAX analogue of the PyTorch ModelOutput)."""
    embeddings: Optional[jax.Array] = None


# Per-buffer block budget.  2 MiB blocks already sit at ~85%+ of HBM copy
# roofline (v6e measurements); with input + output double-buffering (~4x block
# bytes resident) this stays comfortably inside v5e's 16 MiB scoped-VMEM
# default and far under v6e/v7x limits.
_BLOCK_BYTES = 2 * 1024 * 1024


def _identity_copy_kernel(x_ref, o_ref):
    # Pure pass-through of the embedding block (base Encoder has no compute).
    o_ref[...] = x_ref[...]


def _sublane_multiple(dtype) -> int:
    """Native sublane tile height for the dtype (8 f32, 16 bf16, 32 int8/fp8)."""
    itemsize = jnp.dtype(dtype).itemsize
    if itemsize >= 4:
        return 8
    if itemsize == 2:
        return 16
    return 32


def _round_up(x: int, m: int) -> int:
    return ((x + m - 1) // m) * m


@jax.jit
def _pallas_identity(x: jax.Array) -> jax.Array:
    """Out-of-place identity copy realized as a lane-dense, gridded Pallas kernel."""
    n = int(x.size)
    dtype = x.dtype
    itemsize = jnp.dtype(dtype).itemsize
    sub = _sublane_multiple(dtype)

    # Prefer a lane count (multiple of 128) that keeps rows a whole number of
    # native sublane tiles with no padding; otherwise pad the flat array.
    lanes = None
    for cand in (1024, 512, 256, 128):
        if n % cand == 0 and (n // cand) % sub == 0:
            lanes = cand
            break

    flat = x.reshape(-1)
    if lanes is None:
        lanes = 512 if n >= 512 else 128
        tile_elems = sub * lanes
        n_eff = _round_up(max(n, 1), tile_elems)
        flat = jnp.pad(flat, (0, n_eff - n))
        padded = True
    else:
        n_eff = n
        padded = False

    rows = n_eff // lanes  # always a multiple of `sub`
    x2 = flat.reshape(rows, lanes)

    # Block rows: dtype-aware multiple of the sublane tile, capped by the VMEM
    # budget, and small enough that the grid has several steps (DMA pipelining
    # + megacore sharding on v7x).  cdiv handles any remainder block.
    budget_rows = max(sub, (_BLOCK_BYTES // (lanes * itemsize)) // sub * sub)
    target_rows = max(sub, _round_up(pl.cdiv(rows, 4), sub))
    block_rows = min(budget_rows, target_rows, rows)
    grid = (pl.cdiv(rows, block_rows),)

    out2 = pl.pallas_call(
        _identity_copy_kernel,
        out_shape=jax.ShapeDtypeStruct((rows, lanes), dtype),
        grid=grid,
        in_specs=[pl.BlockSpec((block_rows, lanes), lambda i: (i, 0))],
        out_specs=pl.BlockSpec((block_rows, lanes), lambda i: (i, 0)),
        compiler_params=pltpu.CompilerParams(
            dimension_semantics=("parallel",),   # shards grid across v7x's 2 TCs
            vmem_limit_bytes=32 << 20,
        ),
    )(x2)

    out_flat = out2.reshape(-1)
    if padded:
        out_flat = out_flat[:n]
    return out_flat.reshape(x.shape)


def encoder_forward(
    input_ids=None,
    attention_mask=None,
    token_type_ids=None,
    position_ids=None,
    head_mask=None,
    labels=None,
    inputs_embeds=None,
    encoder_hidden_states=None,
    encoder_attention_mask=None,
    output_attentions=None,
    output_hidden_states=None,
    return_dict=None,
    *,
    use_pallas: bool = False,
) -> EncoderOutput:
    """Pallas-backed forward for the (abstract) Encoder base class.

    Mirrors the PyTorch signature.  The reference forward is a no-op stub, so
    the semantics are an identity mapping of `inputs_embeds` to
    `EncoderOutput.embeddings`.  By default no copy (and no kernel) is
    performed; the lane-dense Pallas copy kernel runs only when explicitly
    requested via `use_pallas=True`.
    """
    if inputs_embeds is None:
        # Reference forward body is `pass` -> nothing to compute.
        return EncoderOutput(embeddings=None)

    if not use_pallas:
        # Identity semantics: returning the input avoids any HBM round-trip.
        return EncoderOutput(embeddings=inputs_embeds)

    return EncoderOutput(embeddings=_pallas_identity(inputs_embeds))


if __name__ == "__main__":
    key = jax.random.PRNGKey(0)

    # Small, deterministic example shapes implied by the encoder interface:
    # batch=2, seq=8, hidden=32 (f32).
    batch, seq, hidden = 2, 8, 32
    inputs_embeds = jax.random.normal(key, (batch, seq, hidden), dtype=jnp.float32)

    # Default path: zero-copy identity (no kernel launched).
    out_default = encoder_forward(inputs_embeds=inputs_embeds)
    assert out_default.embeddings is inputs_embeds

    # Forced Pallas path: exercises the lane-dense gridded identity copy.
    out_pallas = encoder_forward(inputs_embeds=inputs_embeds, use_pallas=True)
    jax.block_until_ready(out_pallas.embeddings)
    assert out_pallas.embeddings.shape == (batch, seq, hidden)
    assert out_pallas.embeddings.dtype == inputs_embeds.dtype
    assert bool(jnp.array_equal(out_pallas.embeddings, inputs_embeds))

    # bf16 input with an awkward (non-128-divisible) flat size: exercises the
    # dtype-aware sublane tiling and the padded lane-dense path.
    key2 = jax.random.PRNGKey(0)
    x_bf16 = jax.random.normal(key2, (2, 7, 33), dtype=jnp.float32).astype(jnp.bfloat16)
    out_bf16 = encoder_forward(inputs_embeds=x_bf16, use_pallas=True)
    jax.block_until_ready(out_bf16.embeddings)
    assert out_bf16.embeddings.shape == x_bf16.shape
    assert out_bf16.embeddings.dtype == x_bf16.dtype
    assert bool(jnp.array_equal(out_bf16.embeddings, x_bf16))

    print("KERNEL_OK")
</pallas_src>

<mosaic_0001>
module attributes {stable_mosaic.version = 11 : i64} {
  func.func @_identity_copy_kernel(%arg0: i32, %arg1: memref<8x512xf32, #tpu.memory_space<vmem>>, %arg2: memref<8x512xf32, #tpu.memory_space<vmem>>) attributes {dimension_semantics = [#tpu.dimension_semantics<parallel>], iteration_bounds = array<i64: 1>, scalar_prefetch = 0 : i64, scratch_operands = 0 : i64, tpu.core_type = #tpu.core_type<tc>, window_params = [{transform_indices = @transform_0, window_bounds = array<i64: 8, 512>}, {transform_indices = @transform_1, window_bounds = array<i64: 8, 512>}]} {
    %c0 = arith.constant 0 : index
    %c0_0 = arith.constant 0 : index
    %0 = vector.load %arg1[%c0, %c0_0] : memref<8x512xf32, #tpu.memory_space<vmem>>, vector<8x512xf32>
    %c0_1 = arith.constant 0 : index
    %c0_2 = arith.constant 0 : index
    %1 = vector.load %arg2[%c0_1, %c0_2] : memref<8x512xf32, #tpu.memory_space<vmem>>, vector<8x512xf32>
    tpu.vector_store %arg2[%c0_1, %c0_2], %0 {strides = array<i32>} : memref<8x512xf32, #tpu.memory_space<vmem>>, vector<8x512xf32>,
    return
  }
  func.func @transform_0(%arg0: i32) -> (i32, i32) {
    %c0_i32 = arith.constant 0 : i32
    %c0_i32_0 = arith.constant 0 : i32
    return %arg0, %c0_i32 : i32, i32
  }
  func.func @transform_1(%arg0: i32) -> (i32, i32) {
    %c0_i32 = arith.constant 0 : i32
    %c0_i32_0 = arith.constant 0 : i32
    return %arg0, %c0_i32 : i32, i32
  }
}

</mosaic_0001>

<bundles_post_ra>
// kernel: _pallas_identity.1
= control target key start
LH: loop header
LB: loop body
LE: loop exit
PB: predicated region body
PF: predicated region fallthrough
CT: control target
= control target key end

     0   :  { %s54_s0 = inlined_call_operand.vmem [shape: f32[8,512], index: 0, kind: input, shape index: {}]   ;;  %s55_s1 = inlined_call_operand.vmem [shape: f32[8,512], index: 1, kind: output, shape index: {}]  }
   0x1   :  { %v8_v0 = vld [vmem:[%s54_s0] sm:$0xff]  ;;  %v9_v1 = vld [vmem:[%s54_s0 + $0x8] sm:$0xff]  ;;  %v10_v2 = vld [vmem:[%s54_s0 + $0x10] sm:$0xff] }
   0x2   :  { %12 = vst [vmem:[%s55_s1] sm:$0xff] %v8_v0  ;;  %13 = vst [vmem:[%s55_s1 + $0x8] sm:$0xff] %v9_v1  ;;  %v11_v3 = vld [vmem:[%s54_s0 + $0x18] sm:$0xff] }
   0x3   :  { %14 = vst [vmem:[%s55_s1 + $0x10] sm:$0xff] %v10_v2  ;;  %15 = vst [vmem:[%s55_s1 + $0x18] sm:$0xff] %v11_v3 }

</bundles_post_ra>
